<compile_context>
chip_gen: v7x
topology: tpu7x:2x2x1
jax: 0.10.0
libtpu: 0.0.40
codegen_flags: <defaults>
</compile_context>

<pallas_src>
import functools

import jax
import jax.numpy as jnp
from jax.experimental import pallas as pl
from jax.experimental.pallas import tpu as pltpu

_GRAY_W = (0.2989, 0.587, 0.114)   # torchvision rgb_to_grayscale weights


# ---------------------------------------------------------------------------
# Kernels
# ---------------------------------------------------------------------------
def _contrast_kernel_flat(scalars_ref, img_ref, out_ref, *, hw):
    """Block (bt, 3*hw): channels contiguous along the lane-dense last dim."""
    apply_contrast = scalars_ref[1] > 0.5

    @pl.when(apply_contrast)
    def _():
        f = scalars_ref[0]
        x = img_ref[...].astype(jnp.float32)              # (bt, 3*hw)
        if hw % 128 == 0:
            # Lane-tile-aligned channel slices (free views); grayscale weights
            # applied AFTER the reduces -> no per-pixel weight multiply.
            s = (_GRAY_W[0] * jnp.sum(x[:, :hw], axis=-1, keepdims=True)
                 + _GRAY_W[1] * jnp.sum(x[:, hw:2 * hw], axis=-1, keepdims=True)
                 + _GRAY_W[2] * jnp.sum(x[:, 2 * hw:], axis=-1, keepdims=True))
        else:
            # Layout-agnostic: per-lane grayscale weight + single reduce.
            lane = jax.lax.broadcasted_iota(jnp.int32, (1, 3 * hw), 1)
            w = jnp.where(lane < hw, _GRAY_W[0],
                          jnp.where(lane < 2 * hw, _GRAY_W[1], _GRAY_W[2])
                          ).astype(jnp.float32)
            s = jnp.sum(x * w, axis=-1, keepdims=True)
        mean = s * (1.0 / hw)                             # (bt, 1) per-image mean
        out = f * x + (1.0 - f) * mean                    # torchvision _blend
        out_ref[...] = jnp.clip(out, 0.0, 1.0).astype(out_ref.dtype)

    @pl.when(jnp.logical_not(apply_contrast))
    def _():
        out_ref[...] = img_ref[...]                       # exact pass-through


def _contrast_kernel_rows(scalars_ref, img_ref, out_ref, *, h):
    """Block (bt, 3*h, W): fallback for images too large for the flat path."""
    apply_contrast = scalars_ref[1] > 0.5

    @pl.when(apply_contrast)
    def _():
        f = scalars_ref[0]
        x = img_ref[...].astype(jnp.float32)              # (bt, 3*h, W)
        wpix = x.shape[2]
        if h % 8 == 0:
            s = (_GRAY_W[0] * jnp.sum(x[:, :h, :], axis=(1, 2), keepdims=True)
                 + _GRAY_W[1] * jnp.sum(x[:, h:2 * h, :], axis=(1, 2), keepdims=True)
                 + _GRAY_W[2] * jnp.sum(x[:, 2 * h:, :], axis=(1, 2), keepdims=True))
        else:
            row = jax.lax.broadcasted_iota(jnp.int32, (1, 3 * h, 1), 1)
            w = jnp.where(row < h, _GRAY_W[0],
                          jnp.where(row < 2 * h, _GRAY_W[1], _GRAY_W[2])
                          ).astype(jnp.float32)
            s = jnp.sum(x * w, axis=(1, 2), keepdims=True)
        mean = s * (1.0 / (h * wpix))                     # (bt, 1, 1)
        out = f * x + (1.0 - f) * mean
        out_ref[...] = jnp.clip(out, 0.0, 1.0).astype(out_ref.dtype)

    @pl.when(jnp.logical_not(apply_contrast))
    def _():
        out_ref[...] = img_ref[...]


# ---------------------------------------------------------------------------
# Tiling / VMEM sizing helpers
# ---------------------------------------------------------------------------
def _round_up(x, m):
    return ((x + m - 1) // m) * m


def _chip_info():
    """(tensorcores per chip, scoped-VMEM cap, target block bytes)."""
    try:
        kind = jax.devices()[0].device_kind.lower()
    except Exception:
        kind = ""
    if "v7" in kind:                  # v7x: 2 TCs/chip, only 64 MiB VMEM per TC
        return 2, 48 << 20, 8 << 20
    return 1, 100 << 20, 16 << 20     # v5e / v6e: single TC, 128 MiB VMEM


def _vmem_limit(padded_block_bytes, vmem_cap):
    need = 4 * padded_block_bytes + (8 << 20)   # in + out, double-buffered, + slack
    return int(min(max(need, 16 << 20), vmem_cap))


def _pick_batch_tile_flat(n, img_bytes, sub_mult, num_tc, target_bytes):
    """Batch tile for the lane-dense (N, 3*H*W) layout; None if no layout-legal
    tile fits the block budget (accounts for sublane padding when bt < sub_mult)."""
    if num_tc > 1 and n >= 2 * sub_mult:
        cap = n // 2                  # keep >= 2 grid steps: feed both v7x TCs
    else:
        cap = n                       # single TC: the grid is a serial loop, no cap
    if cap >= n and _round_up(n, sub_mult) * img_bytes <= target_bytes:
        return n                      # whole batch in one block (always legal)
    cap = min(cap, target_bytes // max(img_bytes, 1))
    bt = (cap // sub_mult) * sub_mult  # a tile < N must be a sublane-tile multiple
    return bt if bt >= sub_mult else None


# ---------------------------------------------------------------------------
# Wrappers
# ---------------------------------------------------------------------------
def _adjust_contrast_flat(img, scalars, bt, sub_mult, vmem_cap):
    N, C, H, W = img.shape
    hw = H * W
    x = img.reshape(N, C * hw)                  # row-major contiguous: free reshape
    block_bytes = (_round_up(bt, sub_mult) * _round_up(C * hw, 128)
                   * jnp.dtype(img.dtype).itemsize)
    out = pl.pallas_call(
        functools.partial(_contrast_kernel_flat, hw=hw),
        out_shape=jax.ShapeDtypeStruct((N, C * hw), img.dtype),
        grid=(pl.cdiv(N, bt),),
        in_specs=[pl.BlockSpec(memory_space=pltpu.SMEM),        # [factor, apply]
                  pl.BlockSpec((bt, C * hw), lambda b: (b, 0))],
        out_specs=pl.BlockSpec((bt, C * hw), lambda b: (b, 0)),
        compiler_params=pltpu.CompilerParams(
            dimension_semantics=("parallel",),
            vmem_limit_bytes=_vmem_limit(block_bytes, vmem_cap)),
    )(scalars, x)
    return out.reshape(N, C, H, W)


def _adjust_contrast_rows(img, scalars, bt, sub_mult, vmem_cap):
    N, C, H, W = img.shape
    x = img.reshape(N, C * H, W)                # free reshape
    block_bytes = (bt * _round_up(C * H, sub_mult) * _round_up(W, 128)
                   * jnp.dtype(img.dtype).itemsize)
    out = pl.pallas_call(
        functools.partial(_contrast_kernel_rows, h=H),
        out_shape=jax.ShapeDtypeStruct((N, C * H, W), img.dtype),
        grid=(pl.cdiv(N, bt),),
        in_specs=[pl.BlockSpec(memory_space=pltpu.SMEM),
                  pl.BlockSpec((bt, C * H, W), lambda b: (b, 0, 0))],
        out_specs=pl.BlockSpec((bt, C * H, W), lambda b: (b, 0, 0)),
        compiler_params=pltpu.CompilerParams(
            dimension_semantics=("parallel",),
            vmem_limit_bytes=_vmem_limit(block_bytes, vmem_cap)),
    )(scalars, x)
    return out.reshape(N, C, H, W)


def adjust_contrast_pallas(img, factor, apply):
    """img: (N, 3, H, W) float in [0,1]; factor: scalar f32; apply: scalar bool."""
    N, C, H, W = img.shape
    assert C == 3, "kernel assumes RGB (C == 3)"
    assert jnp.issubdtype(img.dtype, jnp.floating), (
        "kernel reproduces torchvision's float path (bound=1.0); the uint8 path "
        "(bound=255, grayscale rounding) is not implemented")

    itemsize = jnp.dtype(img.dtype).itemsize
    img_bytes = C * H * W * itemsize
    sub_mult = 8 * max(1, 4 // itemsize)        # min sublane tile: 8 (f32), 16 (bf16)
    num_tc, vmem_cap, target_bytes = _chip_info()
    scalars = jnp.stack([jnp.asarray(factor, jnp.float32),
                         jnp.asarray(apply, jnp.float32)])   # (2,) f32 -> SMEM

    bt = _pick_batch_tile_flat(N, img_bytes, sub_mult, num_tc, target_bytes)
    if bt is not None:
        return _adjust_contrast_flat(img, scalars, bt, sub_mult, vmem_cap)

    # Large images: (bt, 3H, W) blocks — minor dims are full extents so any bt
    # is layout-legal, and both sublane (3H) and lane (W) axes stay dense.
    # TODO(synk): two-phase H-tiled kernel (sum pass + blend pass) once a single
    # image's 4x-block pipeline footprint exceeds the per-generation VMEM budget.
    bt = max(1, min(N, target_bytes // max(img_bytes, 1)))
    return _adjust_contrast_rows(img, scalars, bt, sub_mult, vmem_cap)


def random_contrast(img, key, p=0.75):
    """Full RandomContrast forward: random gate + random factor + kernel.
    The gate is resolved inside the kernel (pl.when) -- single HBM pass."""
    k_gate, k_scale = jax.random.split(key)
    apply = jax.random.uniform(k_gate, ()) < p
    scale = jax.random.uniform(k_scale, ()) * 0.5 + 0.7
    return adjust_contrast_pallas(img, scale, apply)


# ---------------------------------------------------------------------------
# Self-test
# ---------------------------------------------------------------------------
if __name__ == "__main__":
    key = jax.random.PRNGKey(0)
    k_img, k_rc = jax.random.split(key)

    # small NCHW RGB image batch in [0, 1]
    img = jax.random.uniform(k_img, (2, 3, 16, 16), dtype=jnp.float32)

    out = random_contrast(img, k_rc, p=0.75)
    jax.block_until_ready(out)
    assert out.shape == img.shape and out.dtype == img.dtype

    # exercise both gate branches deterministically
    out_on = adjust_contrast_pallas(img, jnp.float32(0.9), jnp.bool_(True))
    out_off = adjust_contrast_pallas(img, jnp.float32(0.9), jnp.bool_(False))
    jax.block_until_ready((out_on, out_off))

    # identity branch must be bit-exact pass-through
    assert bool(jnp.all(out_off == img))

    # reference check for the apply branch
    wref = jnp.array(_GRAY_W, jnp.float32).reshape(1, 3, 1, 1)
    mean = jnp.sum(img * wref, axis=(1, 2, 3), keepdims=True) / (16 * 16)
    ref = jnp.clip(0.9 * img + 0.1 * mean, 0.0, 1.0)
    assert bool(jnp.max(jnp.abs(out_on - ref)) < 1e-5)

    # smoke-test the large-image fallback path (rows layout) on the small input
    scal = jnp.stack([jnp.asarray(0.9, jnp.float32), jnp.asarray(True, jnp.float32)])
    out_rows = _adjust_contrast_rows(img, scal, bt=1, sub_mult=8, vmem_cap=100 << 20)
    jax.block_until_ready(out_rows)
    assert bool(jnp.max(jnp.abs(out_rows - ref)) < 1e-5)

    print("KERNEL_OK")
</pallas_src>

<mosaic_0001>
module attributes {stable_mosaic.version = 11 : i64} {
  func.func @_contrast_kernel_flat(%arg0: i32, %arg1: memref<2xf32, #tpu.memory_space<smem>>, %arg2: memref<2x768xf32, #tpu.memory_space<vmem>>, %arg3: memref<2x768xf32, #tpu.memory_space<vmem>>) attributes {dimension_semantics = [#tpu.dimension_semantics<parallel>], iteration_bounds = array<i64: 1>, scalar_prefetch = 0 : i64, scratch_operands = 0 : i64, tpu.core_type = #tpu.core_type<tc>, window_params = [{transform_indices = @transform_0, window_bounds = array<i64: 2>}, {transform_indices = @transform_1, window_bounds = array<i64: 2, 768>}, {transform_indices = @transform_2, window_bounds = array<i64: 2, 768>}]} {
    %c1 = arith.constant 1 : index
    %0 = memref.load %arg1[%c1] : memref<2xf32, #tpu.memory_space<smem>>
    %cst = arith.constant 5.000000e-01 : f32
    %1 = arith.cmpf ogt, %0, %cst : f32
    %2 = arith.extui %1 : i1 to i32
    %c0_i32 = arith.constant 0 : i32
    %3 = arith.cmpi ne, %2, %c0_i32 : i32
    scf.if %3 {
      %c0 = arith.constant 0 : index
      %7 = memref.load %arg1[%c0] : memref<2xf32, #tpu.memory_space<smem>>
      %c0_1 = arith.constant 0 : index
      %c0_2 = arith.constant 0 : index
      %8 = vector.load %arg2[%c0_1, %c0_2] : memref<2x768xf32, #tpu.memory_space<vmem>>, vector<2x768xf32>
      %9 = vector.extract_strided_slice %8 {offsets = [0, 0], sizes = [2, 256], strides = [1, 1]} : vector<2x768xf32> to vector<2x256xf32>
      %cst_3 = arith.constant dense<0.000000e+00> : vector<2xf32>
      %10 = vector.multi_reduction <add>, %9, %cst_3 [1] : vector<2x256xf32> to vector<2xf32>
      %11 = vector.shape_cast %10 : vector<2xf32> to vector<2x1xf32>
      %cst_4 = arith.constant 2.989000e-01 : f32
      %12 = vector.broadcast %cst_4 : f32 to vector<2x1xf32>
      %13 = arith.mulf %12, %11 : vector<2x1xf32>
      %14 = vector.extract_strided_slice %8 {offsets = [0, 256], sizes = [2, 256], strides = [1, 1]} : vector<2x768xf32> to vector<2x256xf32>
      %cst_5 = arith.constant dense<0.000000e+00> : vector<2xf32>
      %15 = vector.multi_reduction <add>, %14, %cst_5 [1] : vector<2x256xf32> to vector<2xf32>
      %16 = vector.shape_cast %15 : vector<2xf32> to vector<2x1xf32>
      %cst_6 = arith.constant 5.870000e-01 : f32
      %17 = vector.broadcast %cst_6 : f32 to vector<2x1xf32>
      %18 = arith.mulf %17, %16 : vector<2x1xf32>
      %19 = arith.addf %13, %18 : vector<2x1xf32>
      %20 = vector.extract_strided_slice %8 {offsets = [0, 512], sizes = [2, 256], strides = [1, 1]} : vector<2x768xf32> to vector<2x256xf32>
      %cst_7 = arith.constant dense<0.000000e+00> : vector<2xf32>
      %21 = vector.multi_reduction <add>, %20, %cst_7 [1] : vector<2x256xf32> to vector<2xf32>
      %22 = vector.shape_cast %21 : vector<2xf32> to vector<2x1xf32>
      %cst_8 = arith.constant 1.140000e-01 : f32
      %23 = vector.broadcast %cst_8 : f32 to vector<2x1xf32>
      %24 = arith.mulf %23, %22 : vector<2x1xf32>
      %25 = arith.addf %19, %24 : vector<2x1xf32>
      %cst_9 = arith.constant 3.906250e-03 : f32
      %26 = vector.broadcast %cst_9 : f32 to vector<2x1xf32>
      %27 = arith.mulf %25, %26 : vector<2x1xf32>
      %28 = vector.broadcast %7 : f32 to vector<2x768xf32>
      %29 = arith.mulf %28, %8 : vector<2x768xf32>
      %cst_10 = arith.constant 1.000000e+00 : f32
      %30 = arith.subf %cst_10, %7 : f32
      %31 = vector.broadcast %30 : f32 to vector<2x1xf32>
      %32 = arith.mulf %31, %27 : vector<2x1xf32>
      %33 = vector.broadcast %32 : vector<2x1xf32> to vector<2x768xf32>
      %34 = arith.addf %29, %33 : vector<2x768xf32>
      %cst_11 = arith.constant 0.000000e+00 : f32
      %cst_12 = arith.constant 1.000000e+00 : f32
      %35 = vector.broadcast %cst_11 : f32 to vector<2x768xf32>
      %36 = arith.maximumf %35, %34 : vector<2x768xf32>
      %37 = vector.broadcast %cst_12 : f32 to vector<2x768xf32>
      %38 = arith.minimumf %37, %36 : vector<2x768xf32>
      %c0_13 = arith.constant 0 : index
      %c0_14 = arith.constant 0 : index
      %39 = vector.load %arg3[%c0_13, %c0_14] : memref<2x768xf32, #tpu.memory_space<vmem>>, vector<2x768xf32>
      tpu.vector_store %arg3[%c0_13, %c0_14], %38 {strides = array<i32>} : memref<2x768xf32, #tpu.memory_space<vmem>>, vector<2x768xf32>,
    } else {
    }
    %true = arith.constant true
    %4 = arith.xori %1, %true : i1
    %5 = arith.extui %4 : i1 to i32
    %c0_i32_0 = arith.constant 0 : i32
    %6 = arith.cmpi ne, %5, %c0_i32_0 : i32
    scf.if %6 {
      %c0 = arith.constant 0 : index
      %c0_1 = arith.constant 0 : index
      %7 = vector.load %arg2[%c0, %c0_1] : memref<2x768xf32, #tpu.memory_space<vmem>>, vector<2x768xf32>
      %c0_2 = arith.constant 0 : index
      %c0_3 = arith.constant 0 : index
      %8 = vector.load %arg3[%c0_2, %c0_3] : memref<2x768xf32, #tpu.memory_space<vmem>>, vector<2x768xf32>
      tpu.vector_store %arg3[%c0_2, %c0_3], %7 {strides = array<i32>} : memref<2x768xf32, #tpu.memory_space<vmem>>, vector<2x768xf32>,
    } else {
    }
    return
  }
  func.func @transform_0(%arg0: i32) -> i32 {
    %c0_i32 = arith.constant 0 : i32
    %c0_i32_0 = arith.constant 0 : i32
    return %c0_i32 : i32
  }
  func.func @transform_1(%arg0: i32) -> (i32, i32) {
    %c0_i32 = arith.constant 0 : i32
    %c0_i32_0 = arith.constant 0 : i32
    return %arg0, %c0_i32 : i32, i32
  }
  func.func @transform_2(%arg0: i32) -> (i32, i32) {
    %c0_i32 = arith.constant 0 : i32
    %c0_i32_0 = arith.constant 0 : i32
    return %arg0, %c0_i32 : i32, i32
  }
}

</mosaic_0001>

<bundles_post_ra>
// kernel: tpu_custom_call.1
= control target key start
LH: loop header
LB: loop body
LE: loop exit
PB: predicated region body
PF: predicated region fallthrough
CT: control target
= control target key end

     0   :  { %7 = vsyncpa [#allocation5], 0  ;;  %s274_s0 = inlined_call_operand.hbm [shape: f32[2], index: 0, kind: input, shape index: {}]   ;;  %s275_s1 = inlined_call_operand.hbm [shape: f32[2,768], index: 1, kind: input, shape index: {}]   ;;  %s276_s2 = inlined_call_operand.hbm [shape: f32[2,768], index: 2, kind: output, shape index: {}]  }
   0x1   :  { %8 = vsyncpa [#allocation3], 0 }
   0x2   :  { %9 = vsyncpa [#allocation4], 0  ;;  %s151_s11 = scalar_lea.hbm %s274_s0, 16 }
   0x3   :  { %p152_p0 = scmp.ne.s32.totalorder %s274_s0, %s151_s11  ;;  %p155_p1 = scmp.lt.u32.totalorder %s151_s11, %s274_s0 }
   0x5   :  { %p157_p2 = pnand %p155_p1, %p152_p0 }
   0x7   :  { %160 = shalt.err (!%p157_p2)
}
   0x8   :  { %s211_s16 = smov [#allocation2]   ;;  %s212_s19 = smov [#allocation6]  }
   0x9   :  { %17 = dma.hbm_to_smem %s274_s0, 16, %s211_s16, [#allocation5]  }
   0xa   :  { %s24_s20 = sshll.u32 %s212_s19, 4  ;;  %s161_s23 = scalar_lea.hbm %s275_s1, 192  ;;  %s25_s20 = int_to_ptr.vmem [resolvable:$true] %s24_s20 }
   0xb   :  { %p162_p3 = scmp.ne.s32.totalorder %s275_s1, %s161_s23  ;;  %p165_p4 = scmp.lt.u32.totalorder %s161_s23, %s275_s1 }
   0xd   :  { %p167_p5 = pnand %p165_p4, %p162_p3 }
   0xf   :  { %170 = shalt.err (!%p167_p5)
}
  0x10   :  { %s171_s28 = scalar_lea.vmem %s25_s20, 192  ;;  %p176_p7 = scmp.lt.s32.totalorder %s25_s20, %s25_s20 }
  0x11   :  { %p172_p6 = scmp.ne.s32.totalorder %s25_s20, %s171_s28  ;;  %p177_p8 = scmp.lt.s32.totalorder %s171_s28, %s171_s28 }
  0x13   :  { %p178_p9 = por %p177_p8, %p176_p7 }
  0x15   :  { %p179_p10 = pnand %p178_p9, %p172_p6 }
  0x17   :  { %182 = shalt.err (!%p179_p10)
}
  0x18   :  { %27 = dma.hbm_to_vmem [thread:$0]  %s275_s1, 192, %s25_s20, [#allocation3]  }
  0x19   :  { %205 = dma.done.wait [#allocation5], 16  }
  0x1a   :  { %206 = vsyncadd [#allocation5], 4294967280 }
  0x1b   :  { %207 = dma.done.wait [#allocation3], 192  }
  0x1c   :  { %208 = vsyncadd [#allocation3], 4294967104 }
  0x1d   :  { %34 = sfence }
  0x1e   :  { %s255_s30 = sld [smem:[#allocation2 + $0x1]] }
  0x24   :  { %p36_p11 = scmp.gt.f32.partialorder %s255_s30, 0.5 }
  0x25   :  { %v47_v0 = vlaneseq (%p36_p11)  ;;  %v213_v1 = vmov (%p36_p11), 1983009808   ;;  %v41_v3 = vld [vmem:[#allocation6] sm:$0xff] (%p36_p11)  ;;  %v42_v7 = vld [vmem:[#allocation6 + $0x8] sm:$0xf] (%p36_p11)  ;;  %vm54_vm0 = vcmask (%p36_p11), 1041408  }
  0x26   :  { %39 = sbr.rel (!%p36_p11) target bundleno = 216 (0xd8), region = 21  ;;  %v45_v2 = vunpack.c.l.s4 (%p36_p11), %v213_v1  ;;  %v61_v6 = vcombine.high (%p36_p11), %v41_v3, %v41_v3  ;;  %s40_s1 = sld [smem:[#allocation2]] (%p36_p11)  ;;  %v214_v26 = vmov (%p36_p11), 269488144  }
  0x27   :  { %v48_v4 = vshrl.u32 (%p36_p11), %v47_v0, 7  ;;  %v106_v27 = vunpack.c.l.s4 (%p36_p11), %v214_v26 }
  0x28   :  { %v46_v5 = vunpack.c.0.s8 (%p36_p11), %v45_v2 }
  0x29   :  { %v107_v33 = vunpack.c.0.s8 (%p36_p11), %v106_v27 }
  0x2a   :  { %v49_v8 = vsub.s32 (%p36_p11), %v46_v5, %v48_v4 }
  0x2b   :  { %v110_v37 = vsub.s32 (%p36_p11), %v107_v33, %v48_v4 }
  0x2c   :  { %v50_v9 = vrot.slane (%p36_p11), %v41_v3, %v49_v8  ;;  %v68_v10 = vrot.slane (%p36_p11), %v61_v6, %v49_v8  ;;  %v86_v11 = vrot.slane (%p36_p11), %v42_v7, %v49_v8  ;;  %s101_s3 = ssub.f32 (%p36_p11), 1.0, %s40_s1  ;;  %v98_v35 = vstv (%p36_p11), %s40_s1 }
  0x2d   :  { %v99_v39 = vmul.f32 %v98_v35, %v41_v3  ;;  %v100_v40 = vmul.f32 %v98_v35, %v42_v7 }
  0x2e   :  { %v51_v12 = vcombine.high %v50_v9, %v50_v9  ;;  %v55_v13 = vsel %vm54_vm0, %v50_v9, 0.0  ;;  %v69_v14 = vcombine.high %v68_v10, %v68_v10  ;;  %v87_v15 = vcombine.high %v86_v11, %v86_v11 }
  0x2f   :  { %v90_v16 = vsel %vm54_vm0, %v86_v11, 0.0  ;;  %v72_v18 = vsel %vm54_vm0, %v68_v10, 0.0  ;;  %v102_v36 = vstv %s101_s3 }
  0x30   :  { %v56_v17 = vsel %vm54_vm0, %v51_v12, 0.0  ;;  %v73_v19 = vsel %vm54_vm0, %v69_v14, 0.0  ;;  %v91_v21 = vsel %vm54_vm0, %v87_v15, 0.0 }
  0x31   :  { %v57_v20 = vadd.f32 %v56_v17, %v55_v13  ;;  %v92_v22 = vadd.f32 %v91_v21, %v90_v16  ;;  %v74_v23 = vadd.f32 %v73_v19, %v72_v18 }
  0x33   :  { %58 = vadd.xlane.f32.xlu0 %v57_v20  ;;  %93 = vadd.xlane.f32.xlu1 %v92_v22 }
  0x37   :  { %75 = vadd.xlane.f32.xlu0 %v74_v23 }
  0xc0   :  { %v59_v24 = vpop.xlane.xlu0 %58  ;;  %v94_v25 = vpop.xlane.xlu1 %93 }
  0xc1   :  { %v60_v29 = vmul.f32 0.2989, %v59_v24  ;;  %v95_v31 = vmul.f32 0.114, %v94_v25 }
  0xc4   :  { %v76_v28 = vpop.xlane.xlu0 %75 }
  0xc5   :  { %v77_v30 = vmul.f32 0.587, %v76_v28 }
  0xc7   :  { %v78_v32 = vadd.f32 %v77_v30, %v60_v29 }
  0xc9   :  { %v96_v34 = vadd.f32 %v95_v31, %v78_v32 }
  0xcb   :  { %v97_v38 = vmul.f32 0.00390625, %v96_v34 }
  0xcd   :  { %v103_v41 = vmul.f32 %v102_v36, %v97_v38 }
  0xcf   :  { %v111_v42 = vrot.slane %v103_v41, %v110_v37 }
  0xd1   :  { %v113_v43 = vadd.f32 %v111_v42, %v99_v39  ;;  %v114_v44 = vadd.f32 %v111_v42, %v100_v40 }
  0xd3   :  { %v115_v45 = vmax.f32 %v113_v43, 0.0  ;;  %v116_v46 = vmax.f32 %v114_v44, 0.0 }
  0xd5   :  { %v117_v47 = vmin.f32 %v115_v45, 1.0  ;;  %v118_v48 = vmin.f32 %v116_v46, 1.0 }
  0xd7   :  { %119 = vst [vmem:[#allocation7] sm:$0xff] %v117_v47  ;;  %120 = vst [vmem:[#allocation7 + $0x8] sm:$0xf] %v118_v48 }
  0xd8 PF:  { %123 = sbr.rel (%p36_p11) target bundleno = 223 (0xdf), region = 25  ;;  %v124_v49 = vld [vmem:[#allocation6] sm:$0xff] (!%p36_p11)  ;;  %v125_v50 = vld [vmem:[#allocation6 + $0x8] sm:$0xf] (!%p36_p11) }
  0xd9   :  { %126 = vst [vmem:[#allocation7] sm:$0xff] (!%p36_p11), %v124_v49  ;;  %127 = vst [vmem:[#allocation7 + $0x8] sm:$0xf] (!%p36_p11), %v125_v50 }
  0xdf PF:  { %s215_s4 = smov [#allocation7]  }
  0xe0   :  { %s134_s5 = sshll.u32 %s215_s4, 4  ;;  %s135_s5 = int_to_ptr.vmem [resolvable:$true] %s134_s5 }
  0xe1   :  { %s183_s6 = scalar_lea.vmem %s135_s5, 192  ;;  %p188_p13 = scmp.lt.s32.totalorder %s135_s5, %s135_s5 }
  0xe2   :  { %p184_p12 = scmp.ne.s32.totalorder %s135_s5, %s183_s6  ;;  %p189_p0 = scmp.lt.s32.totalorder %s183_s6, %s183_s6 }
  0xe4   :  { %p190_p1 = por %p189_p0, %p188_p13 }
  0xe6   :  { %p191_p2 = pnand %p190_p1, %p184_p12 }
  0xe8   :  { %194 = shalt.err (!%p191_p2)
}
  0xe9   :  { %s195_s9 = scalar_lea.hbm %s276_s2, 192 }
  0xea   :  { %p196_p3 = scmp.ne.s32.totalorder %s276_s2, %s195_s9  ;;  %p199_p4 = scmp.lt.u32.totalorder %s195_s9, %s276_s2 }
  0xec   :  { %p201_p5 = pnand %p199_p4, %p196_p3 }
  0xee   :  { %204 = shalt.err (!%p201_p5)
}
  0xef   :  { %137 = dma.vmem_to_hbm [thread:$0]  %s135_s5, 192, %s276_s2, [#allocation4]  }
  0xf0   :  { %209 = dma.done.wait [#allocation4], 192  }
  0xf1   :  { %210 = vsyncadd [#allocation4], 4294967104 }
  0xf2   :  { %141 = vsyncpa [#allocation3], 1 }
  0xf3   :  { %142 = vsyncpa [#allocation4], 1 }
  0xf4   :  { %143 = vsyncpa [#allocation5], 1 }

</bundles_post_ra>
